<compile_context>
chip_gen: v7x
topology: tpu7x:2x2x1
jax: 0.10.0
libtpu: 0.0.40
codegen_flags: <defaults>
</compile_context>

<pallas_src>
import functools
import math

import jax
import jax.numpy as jnp
from jax.experimental import pallas as pl
from jax.experimental.pallas import tpu as pltpu

FEAT_DIM = 579              # 40 mfcc + 12 chroma + 128 mel + 7 contrast + 6 tonnetz (x3 ch)
H1, H2, H3 = 512, 256, 128
OUT_DIM = 3
OUT_PAD = 128               # lane-dense padded output
W34_ROWS = H2 + H3          # 384: [W3 (256,128) | W4 padded (128,128)]
BIAS_LEN = H1 + H2 + H3 + OUT_PAD   # 1024: [b1 | b2 | b3 | b4 padded], 128-aligned slices


def _mlp_kernel(x_ref, w1_ref, w2_ref, w34_ref, b_ref, o_ref):
    """4-layer MLP, fully VMEM-resident.

    Weights are bf16, matmuls accumulate in f32 on the MXU, bias add / ReLU
    stay in f32 on the VPU.  Works for any leading batch-tile size.
    """
    b = b_ref[...]                                           # (1, 1024) f32

    # Layer 1: K = 579 contraction (non-aligned remainder handled by Mosaic).
    h = jnp.dot(x_ref[...].astype(jnp.bfloat16), w1_ref[...],
                preferred_element_type=jnp.float32)          # (B, 512)
    h = jnp.maximum(h + b[:, 0:H1], 0.0)

    # Layer 2.
    h = jnp.dot(h.astype(jnp.bfloat16), w2_ref[...],
                preferred_element_type=jnp.float32)          # (B, 256)
    h = jnp.maximum(h + b[:, H1:H1 + H2], 0.0)

    # Layer 3: rows [0, 256) of the packed W3|W4 buffer.
    h = jnp.dot(h.astype(jnp.bfloat16), w34_ref[0:H2, :],
                preferred_element_type=jnp.float32)          # (B, 128)
    h = jnp.maximum(h + b[:, H1 + H2:H1 + H2 + H3], 0.0)

    # Layer 4: rows [256, 384); output lanes >= 3 are zero padding by design.
    o = jnp.dot(h.astype(jnp.bfloat16), w34_ref[H2:W34_ROWS, :],
                preferred_element_type=jnp.float32)          # (B, 128)
    o_ref[...] = o + b[:, H1 + H2 + H3:BIAS_LEN]


def _cost_estimate(batch):
    flops = 2 * batch * (FEAT_DIM * H1 + H1 * H2 + H2 * H3 + H3 * OUT_DIM)
    bytes_accessed = (
        2 * (FEAT_DIM * H1 + H1 * H2 + W34_ROWS * OUT_PAD)   # bf16 weights
        + 4 * BIAS_LEN                                       # f32 biases
        + 4 * batch * FEAT_DIM                               # f32 features
        + 4 * batch * OUT_PAD)                               # f32 output
    return pl.CostEstimate(flops=flops, transcendentals=0,
                           bytes_accessed=bytes_accessed)


def prepare_params(params):
    """One-time preparation: pack W3/W4 and all biases, cast weights to bf16.

    Call once at model-load time; pass the result to the forward functions.
    """
    w1, b1, w2, b2, w3, b3, w4, b4 = params

    # W4: (128, 3) -> (128, 128) lane-dense, then pack under W3 -> (384, 128).
    w4p = jnp.zeros((H3, OUT_PAD), jnp.float32).at[:, :OUT_DIM].set(w4)
    w34 = jnp.concatenate([w3, w4p], axis=0)

    # Single f32 bias buffer (1, 1024): [b1 | b2 | b3 | b4 padded to 128].
    b4p = jnp.zeros((OUT_PAD,), jnp.float32).at[:OUT_DIM].set(b4)
    biases = jnp.concatenate([b1, b2, b3, b4p]).reshape(1, BIAS_LEN)

    return (w1.astype(jnp.bfloat16),          # (579, 512)
            w2.astype(jnp.bfloat16),          # (512, 256)
            w34.astype(jnp.bfloat16),         # (384, 128)
            biases.astype(jnp.float32))       # (1, 1024)


@jax.jit
def gender_detector_forward(features, prepared_params):
    """features: (579,) f32 feature vector (output of extract_features+flatten).

    prepared_params: output of prepare_params().  Returns (1, 3) f32 logits,
    matching `logits.unsqueeze(0)` in PyTorch (eval-mode semantics).
    """
    w1, w2, w34, biases = prepared_params
    x = features.astype(jnp.float32).reshape(1, FEAT_DIM)    # metadata only

    vmem = pl.BlockSpec(memory_space=pltpu.MemorySpace.VMEM)
    out = pl.pallas_call(
        _mlp_kernel,
        out_shape=jax.ShapeDtypeStruct((1, OUT_PAD), jnp.float32),
        in_specs=[vmem] * 5,
        out_specs=vmem,
        cost_estimate=_cost_estimate(1),
    )(x, w1, w2, w34, biases)

    # Lanes >= 3 are padding garbage-free zeros+bias by design; slice them off.
    return out[0, :OUT_DIM].reshape(1, OUT_DIM)


@functools.partial(jax.jit, static_argnames=("block_rows",))
def gender_detector_forward_batched(features, prepared_params, *, block_rows=8):
    """features: (B, 579) f32, B a multiple of block_rows.  Returns (B, 3).

    Weights stay VMEM-resident across the grid (constant index_map); the batch
    axis is marked "parallel" so v7x's two TensorCores split the rows.
    """
    w1, w2, w34, biases = prepared_params
    batch = features.shape[0]
    if batch % block_rows != 0:
        raise ValueError(f"batch {batch} must be a multiple of {block_rows}")

    out = pl.pallas_call(
        _mlp_kernel,
        out_shape=jax.ShapeDtypeStruct((batch, OUT_PAD), jnp.float32),
        grid=(batch // block_rows,),
        in_specs=[
            pl.BlockSpec((block_rows, FEAT_DIM), lambda i: (i, 0)),
            pl.BlockSpec((FEAT_DIM, H1), lambda i: (0, 0)),
            pl.BlockSpec((H1, H2), lambda i: (0, 0)),
            pl.BlockSpec((W34_ROWS, OUT_PAD), lambda i: (0, 0)),
            pl.BlockSpec((1, BIAS_LEN), lambda i: (0, 0)),
        ],
        out_specs=pl.BlockSpec((block_rows, OUT_PAD), lambda i: (i, 0)),
        compiler_params=pltpu.CompilerParams(
            dimension_semantics=("parallel",)),
        cost_estimate=_cost_estimate(batch),
    )(features.astype(jnp.float32), w1, w2, w34, biases)

    return out[:, :OUT_DIM]


def _init_linear(key, fan_in, fan_out):
    """Mimics nn.Linear default init: U(-1/sqrt(fan_in), +1/sqrt(fan_in))."""
    kw, kb = jax.random.split(key)
    bound = 1.0 / math.sqrt(fan_in)
    w = jax.random.uniform(kw, (fan_in, fan_out), jnp.float32, -bound, bound)
    b = jax.random.uniform(kb, (fan_out,), jnp.float32, -bound, bound)
    return w, b


def init_params(key):
    k1, k2, k3, k4 = jax.random.split(key, 4)
    w1, b1 = _init_linear(k1, FEAT_DIM, H1)
    w2, b2 = _init_linear(k2, H1, H2)
    w3, b3 = _init_linear(k3, H2, H3)
    w4, b4 = _init_linear(k4, H3, OUT_DIM)
    return (w1, b1, w2, b2, w3, b3, w4, b4)


def _reference(feats_2d, params):
    """Plain-JAX reference mimicking the kernel's bf16-weight/activation rounding."""
    def _bf(a):
        return a.astype(jnp.bfloat16).astype(jnp.float32)

    w1, b1, w2, b2, w3, b3, w4, b4 = params
    h = jnp.maximum(_bf(feats_2d) @ _bf(w1) + b1, 0.0)
    h = jnp.maximum(_bf(h) @ _bf(w2) + b2, 0.0)
    h = jnp.maximum(_bf(h) @ _bf(w3) + b3, 0.0)
    return _bf(h) @ _bf(w4) + b4


if __name__ == "__main__":
    key = jax.random.PRNGKey(0)
    k_params, k_feat, k_batch = jax.random.split(key, 3)

    params = init_params(k_params)
    prepared = prepare_params(params)          # one-time, outside the hot path

    # Synthetic feature vectors (stand-in for librosa extract_features).
    features = jax.random.normal(k_feat, (FEAT_DIM,), jnp.float32)
    feats_batch = jax.random.normal(k_batch, (16, FEAT_DIM), jnp.float32)

    # Single-sample path (matches PyTorch forward: (1, 3) logits).
    logits = gender_detector_forward(features, prepared)
    jax.block_until_ready(logits)
    assert logits.shape == (1, OUT_DIM), logits.shape
    assert logits.dtype == jnp.float32

    ref = _reference(features.reshape(1, FEAT_DIM), params)
    assert jnp.allclose(logits, ref, atol=1e-2, rtol=1e-2), (logits, ref)

    # Batched path (throughput entry point).
    logits_b = gender_detector_forward_batched(feats_batch, prepared)
    jax.block_until_ready(logits_b)
    assert logits_b.shape == (16, OUT_DIM), logits_b.shape

    ref_b = _reference(feats_batch, params)
    assert jnp.allclose(logits_b, ref_b, atol=1e-2, rtol=1e-2), (logits_b, ref_b)

    print("KERNEL_OK")
</pallas_src>

<mosaic_0001>
module attributes {stable_mosaic.version = 11 : i64} {
  func.func @_mlp_kernel(%arg0: memref<1x579xf32, #tpu.memory_space<vmem>>, %arg1: memref<579x512xbf16, #tpu.memory_space<vmem>>, %arg2: memref<512x256xbf16, #tpu.memory_space<vmem>>, %arg3: memref<384x128xbf16, #tpu.memory_space<vmem>>, %arg4: memref<1x1024xf32, #tpu.memory_space<vmem>>, %arg5: memref<1x128xf32, #tpu.memory_space<vmem>>) attributes {dimension_semantics = [], scalar_prefetch = 0 : i64, scratch_operands = 0 : i64, tpu.core_type = #tpu.core_type<tc>} {
    %c0 = arith.constant 0 : index
    %c0_0 = arith.constant 0 : index
    %0 = vector.load %arg4[%c0, %c0_0] : memref<1x1024xf32, #tpu.memory_space<vmem>>, vector<1x1024xf32>
    %c0_1 = arith.constant 0 : index
    %c0_2 = arith.constant 0 : index
    %1 = vector.load %arg0[%c0_1, %c0_2] : memref<1x579xf32, #tpu.memory_space<vmem>>, vector<1x579xf32>
    %2 = arith.truncf %1 : vector<1x579xf32> to vector<1x579xbf16>
    %c0_3 = arith.constant 0 : index
    %c0_4 = arith.constant 0 : index
    %3 = vector.load %arg1[%c0_3, %c0_4] : memref<579x512xbf16, #tpu.memory_space<vmem>>, vector<579x512xbf16>
    %cst = arith.constant dense<0.000000e+00> : vector<1x512xf32>
    %4 = tpu.matmul %2, %3, %cst {dimension_numbers = #tpu.dot_dimension_numbers<[1], [0], [0], [1], [0, 0, 1, 1], [], []>} : vector<1x579xbf16>, vector<579x512xbf16>, vector<1x512xf32> -> vector<1x512xf32>
    %5 = vector.extract_strided_slice %0 {offsets = [0, 0], sizes = [1, 512], strides = [1, 1]} : vector<1x1024xf32> to vector<1x512xf32>
    %6 = arith.addf %4, %5 : vector<1x512xf32>
    %cst_5 = arith.constant 0.000000e+00 : f32
    %7 = vector.broadcast %cst_5 : f32 to vector<1x512xf32>
    %8 = arith.maximumf %6, %7 : vector<1x512xf32>
    %9 = arith.truncf %8 : vector<1x512xf32> to vector<1x512xbf16>
    %c0_6 = arith.constant 0 : index
    %c0_7 = arith.constant 0 : index
    %10 = vector.load %arg2[%c0_6, %c0_7] : memref<512x256xbf16, #tpu.memory_space<vmem>>, vector<512x256xbf16>
    %cst_8 = arith.constant dense<0.000000e+00> : vector<1x256xf32>
    %11 = tpu.matmul %9, %10, %cst_8 {dimension_numbers = #tpu.dot_dimension_numbers<[1], [0], [0], [1], [0, 0, 1, 1], [], []>} : vector<1x512xbf16>, vector<512x256xbf16>, vector<1x256xf32> -> vector<1x256xf32>
    %12 = vector.extract_strided_slice %0 {offsets = [0, 512], sizes = [1, 256], strides = [1, 1]} : vector<1x1024xf32> to vector<1x256xf32>
    %13 = arith.addf %11, %12 : vector<1x256xf32>
    %cst_9 = arith.constant 0.000000e+00 : f32
    %14 = vector.broadcast %cst_9 : f32 to vector<1x256xf32>
    %15 = arith.maximumf %13, %14 : vector<1x256xf32>
    %16 = arith.truncf %15 : vector<1x256xf32> to vector<1x256xbf16>
    %c0_10 = arith.constant 0 : index
    %c0_11 = arith.constant 0 : index
    %17 = vector.load %arg3[%c0_10, %c0_11] : memref<384x128xbf16, #tpu.memory_space<vmem>>, vector<256x128xbf16>
    %cst_12 = arith.constant dense<0.000000e+00> : vector<1x128xf32>
    %18 = tpu.matmul %16, %17, %cst_12 {dimension_numbers = #tpu.dot_dimension_numbers<[1], [0], [0], [1], [0, 0, 1, 1], [], []>} : vector<1x256xbf16>, vector<256x128xbf16>, vector<1x128xf32> -> vector<1x128xf32>
    %19 = vector.extract_strided_slice %0 {offsets = [0, 768], sizes = [1, 128], strides = [1, 1]} : vector<1x1024xf32> to vector<1x128xf32>
    %20 = arith.addf %18, %19 : vector<1x128xf32>
    %cst_13 = arith.constant 0.000000e+00 : f32
    %21 = vector.broadcast %cst_13 : f32 to vector<1x128xf32>
    %22 = arith.maximumf %20, %21 : vector<1x128xf32>
    %23 = arith.truncf %22 : vector<1x128xf32> to vector<1x128xbf16>
    %c256 = arith.constant 256 : index
    %c0_14 = arith.constant 0 : index
    %24 = vector.load %arg3[%c256, %c0_14] : memref<384x128xbf16, #tpu.memory_space<vmem>>, vector<128x128xbf16>
    %cst_15 = arith.constant dense<0.000000e+00> : vector<1x128xf32>
    %25 = tpu.matmul %23, %24, %cst_15 {dimension_numbers = #tpu.dot_dimension_numbers<[1], [0], [0], [1], [0, 0, 1, 1], [], []>} : vector<1x128xbf16>, vector<128x128xbf16>, vector<1x128xf32> -> vector<1x128xf32>
    %26 = vector.extract_strided_slice %0 {offsets = [0, 896], sizes = [1, 128], strides = [1, 1]} : vector<1x1024xf32> to vector<1x128xf32>
    %27 = arith.addf %25, %26 : vector<1x128xf32>
    %c0_16 = arith.constant 0 : index
    %c0_17 = arith.constant 0 : index
    %28 = vector.load %arg5[%c0_16, %c0_17] : memref<1x128xf32, #tpu.memory_space<vmem>>, vector<1x128xf32>
    tpu.vector_store %arg5[%c0_16, %c0_17], %27 {strides = array<i32>} : memref<1x128xf32, #tpu.memory_space<vmem>>, vector<1x128xf32>,
    return
  }
}

</mosaic_0001>

<bundles_post_ra>
// kernel: gender_detector_forward.1
= control target key start
LH: loop header
LB: loop body
LE: loop exit
PB: predicated region body
PF: predicated region fallthrough
CT: control target
= control target key end

     0   :  { %10 = vsyncpa [#allocation3], 0  ;;  %s2968_s0 = inlined_call_operand.vmem [shape: f32[1,579], index: 0, kind: input, shape index: {}]   ;;  %s2969_s1 = inlined_call_operand.hbm [shape: bf16[579,512], index: 1, kind: input, shape index: {}]   ;;  %s2970_s2 = inlined_call_operand.hbm [shape: bf16[512,256], index: 2, kind: input, shape index: {}]   ;;  %s2971_s3 = inlined_call_operand.hbm [shape: bf16[384,128], index: 3, kind: input, shape index: {}]   ;;  %s2972_s4 = inlined_call_operand.vmem [shape: f32[1,1024], index: 4, kind: input, shape index: {}]   ;;  %s2973_s5 = inlined_call_operand.hbm [shape: f32[1,128], index: 5, kind: output, shape index: {}]  }
   0x1   :  { %11 = vsyncpa [#allocation6], 0 }
   0x2   :  { %12 = vsyncpa [#allocation4], 0  ;;  %s2809_s18 = smov [#allocation5]   ;;  %s2715_s22 = scalar_lea.hbm %s2970_s2, 8192 }
   0x3   :  { %s32_s19 = sshll.u32 %s2809_s18, 4  ;;  %p2716_p0 = scmp.ne.s32.totalorder %s2970_s2, %s2715_s22  ;;  %s33_s19 = int_to_ptr.vmem [resolvable:$true] %s32_s19 }
   0x4   :  { %p2719_p1 = scmp.lt.u32.totalorder %s2715_s22, %s2970_s2 }
   0x6   :  { %p2721_p2 = pnand %p2719_p1, %p2716_p0 }
   0x8   :  { %2724 = shalt.err (!%p2721_p2)
}
   0x9   :  { %s2725_s27 = scalar_lea.vmem %s33_s19, 8192  ;;  %p2730_p4 = scmp.lt.s32.totalorder %s33_s19, %s33_s19 }
   0xa   :  { %p2726_p3 = scmp.ne.s32.totalorder %s33_s19, %s2725_s27  ;;  %p2731_p5 = scmp.lt.s32.totalorder %s2725_s27, %s2725_s27 }
   0xc   :  { %p2732_p6 = por %p2731_p5, %p2730_p4 }
   0xe   :  { %p2733_p7 = pnand %p2732_p6, %p2726_p3 }
  0x10   :  { %2736 = shalt.err (!%p2733_p7)
}
  0x11   :  { %s2810_s28 = smov 128   ;;  %s2811_s29 = smov 8  }
  0x12   :  { %38 = dma.hbm_to_vmem [thread:$0]  %s2970_s2, 8192, %s33_s19, [#allocation6], %s2810_s28, %s2810_s28, %s2811_s29  }
  0x13   :  { %s2812_s7 = smov [#allocation2]   ;;  %s2737_s11 = scalar_lea.hbm %s2969_s1, 18688 }
  0x14   :  { %s20_s8 = sshll.u32 %s2812_s7, 4  ;;  %p2738_p8 = scmp.ne.s32.totalorder %s2969_s1, %s2737_s11  ;;  %s21_s8 = int_to_ptr.vmem [resolvable:$true] %s20_s8 }
  0x15   :  { %p2741_p9 = scmp.lt.u32.totalorder %s2737_s11, %s2969_s1 }
  0x17   :  { %p2743_p10 = pnand %p2741_p9, %p2738_p8 }
  0x19   :  { %2746 = shalt.err (!%p2743_p10)
}
  0x1a   :  { %s2747_s16 = scalar_lea.vmem %s21_s8, 18688  ;;  %p2752_p12 = scmp.lt.s32.totalorder %s21_s8, %s21_s8 }
  0x1b   :  { %p2748_p11 = scmp.ne.s32.totalorder %s21_s8, %s2747_s16  ;;  %p2753_p13 = scmp.lt.s32.totalorder %s2747_s16, %s2747_s16 }
  0x1d   :  { %p2754_p0 = por %p2753_p13, %p2752_p12 }
  0x1f   :  { %p2755_p1 = pnand %p2754_p0, %p2748_p11 }
  0x21   :  { %2758 = shalt.err (!%p2755_p1)
}
  0x22   :  { %s2813_s2 = smov 256   ;;  %s2814_s17 = smov 16  }
  0x23   :  { %26 = dma.hbm_to_vmem [thread:$0]  %s2969_s1, 18688, %s21_s8, [#allocation3], %s2813_s2, %s2813_s2, %s2814_s17  }
  0x24   :  { %s2815_s20 = smov [#allocation7]   ;;  %s2759_s24 = scalar_lea.hbm %s2971_s3, 3072 }
  0x25   :  { %s44_s21 = sshll.u32 %s2815_s20, 4  ;;  %p2760_p2 = scmp.ne.s32.totalorder %s2971_s3, %s2759_s24  ;;  %s45_s21 = int_to_ptr.vmem [resolvable:$true] %s44_s21 }
  0x26   :  { %p2763_p3 = scmp.lt.u32.totalorder %s2759_s24, %s2971_s3 }
  0x28   :  { %p2765_p4 = pnand %p2763_p3, %p2760_p2 }
  0x2a   :  { %2768 = shalt.err (!%p2765_p4)
}
  0x2b   :  { %s2769_s29 = scalar_lea.vmem %s45_s21, 3072  ;;  %p2774_p6 = scmp.lt.s32.totalorder %s45_s21, %s45_s21 }
  0x2c   :  { %p2770_p5 = scmp.ne.s32.totalorder %s45_s21, %s2769_s29  ;;  %p2775_p7 = scmp.lt.s32.totalorder %s2769_s29, %s2769_s29 }
  0x2e   :  { %p2776_p8 = por %p2775_p7, %p2774_p6 }
  0x30   :  { %p2777_p9 = pnand %p2776_p8, %p2770_p5 }
  0x32   :  { %2780 = shalt.err (!%p2777_p9)
}
  0x33   :  { %s2816_s1 = smov 64   ;;  %s2817_s30 = smov 4  }
  0x34   :  { %50 = dma.hbm_to_vmem [thread:$0]  %s2971_s3, 3072, %s45_s21, [#allocation6], %s2816_s1, %s2816_s1, %s2817_s30  }
  0x35   :  { %2803 = dma.done.wait [#allocation3], 18688  }
  0x36   :  { %2804 = vsyncadd [#allocation3], 4294948608 }
  0x37   :  { %2805 = dma.done.wait [#allocation6], 11264  }
  0x38   :  { %2806 = vsyncadd [#allocation6], 4294956032  ;;  %v2818_v0 = vmov 0   ;;  %v2375_v1 = vld [vmem:[#allocation2 + $0x4] ss:$16 sps:$4 sm:$0xff]   ;;  %v66_v8 = vlaneseq  ;;  %vm997_vm0 = vcmask 1040384  }
  0x39   :  { %1127 = vmatprep.mubr.bf16.mxu1 %v2818_v0  ;;  %v2377_v2 = vld [vmem:[#allocation2 + $0x404] ss:$16 sps:$4 sm:$0xff]   ;;  %1013 = vmatprep.subr.bf16.mxu0 %v2375_v1  ;;  %v2379_v3 = vld [vmem:[#allocation2] ss:$16 sps:$4 sm:$0xff]   ;;  %vm998_vm1 = vcmask 1041408   ;;  %v2819_v15 = vmov 65535  }
  0x3a   :  { %v2380_v4 = vld [vmem:[#allocation2 + $0x400] ss:$16 sps:$4 sm:$0xff]   ;;  %1095 = vmatprep.subr.bf16.mxu1 %v2377_v2  ;;  %v2381_v5 = vld [vmem:[#allocation2 + $0x24] ss:$16 sps:$4 sm:$0xff]   ;;  %1014 = vmatpush1.bf16.msra.mxu0 %v2379_v3  ;;  %v999_v16 = vsel %vm997_vm0, 4294967295, %v2819_v15  ;;  %v2890_v17 = vshrl.u32 %v66_v8, 7 }
  0x3b   :  { %1096 = vmatpush1.bf16.msra.mxu1 %v2380_v4  ;;  %v2383_v6 = vld [vmem:[#allocation2 + $0x424] ss:$16 sps:$4 sm:$0xff]   ;;  %v2385_v7 = vld [vmem:[#allocation2 + $0x20] ss:$16 sps:$4 sm:$0xff]   ;;  %1015 = vmatprep.subr.bf16.mxu0 %v2381_v5  ;;  %v2892_v21 = vsel %vm998_vm1, %v999_v16, 0  ;;  %vm993_vm2 = vcmask 547840  }
  0x3c   :  { %v2386_v9 = vld [vmem:[#allocation2 + $0x420] ss:$16 sps:$4 sm:$0xff]   ;;  %1097 = vmatprep.subr.bf16.mxu1 %v2383_v6  ;;  %v2387_v10 = vld [vmem:[#allocation2 + $0x44] ss:$16 sps:$4 sm:$0xff]   ;;  %v84_v25 = vsub.s32 4, %v2890_v17  ;;  %v72_v26 = vsub.s32 1, %v2890_v17 }
  0x3d   :  { %v2389_v11 = vld [vmem:[#allocation2 + $0x444] ss:$16 sps:$4 sm:$0xff]   ;;  %v2391_v12 = vld [vmem:[#allocation2 + $0x40] ss:$16 sps:$4 sm:$0xff]   ;;  %v2408_v35 = vld [vmem:[#allocation2 + $0xc] ss:$16 sps:$4 sm:$0xff]  }
  0x3e   :  { %v2392_v13 = vld [vmem:[#allocation2 + $0x440] ss:$16 sps:$4 sm:$0xff]   ;;  %1016 = vmatpush1.bf16.msra.mxu0 %v2385_v7  ;;  %v2393_v14 = vld [vmem:[#allocation2 + $0x64] ss:$16 sps:$4 sm:$0xff]   ;;  %v2406_v37 = vld [vmem:[#allocation2 + $0x8] ss:$16 sps:$4 sm:$0xff]  }
  0x3f   :  { %1098 = vmatpush1.bf16.msra.mxu1 %v2386_v9  ;;  %1017 = vmatprep.subr.bf16.mxu0 %v2387_v10  ;;  %v2395_v18 = vld [vmem:[#allocation2 + $0x464] ss:$16 sps:$4 sm:$0xff]   ;;  %v2397_v19 = vld [vmem:[#allocation2 + $0x60] ss:$16 sps:$4 sm:$0xff]   ;;  %v2414_v41 = vld [vmem:[#allocation2 + $0x2c] ss:$16 sps:$4 sm:$0xff]  }
  0x40   :  { %1099 = vmatprep.subr.bf16.mxu1 %v2389_v11  ;;  %v240_v20 = vld [vmem:[#allocation2 + $0x480] sm:$0x33]  ;;  %v2900_v29 = vld [vmem:[%s2968_s0] sm:$0x1f]  ;;  %v2412_v42 = vld [vmem:[#allocation2 + $0x28] ss:$16 sps:$4 sm:$0xff]  }
  0x41   :  { %v2398_v22 = vld [vmem:[#allocation2 + $0x460] ss:$16 sps:$4 sm:$0xff]   ;;  %v2193_v23 = vcombine.high %v240_v20, %v240_v20  ;;  %v2192_v24 = vcombine.low %v240_v20, %v240_v20  ;;  %v2399_v27 = vld [vmem:[#allocation2 + $0x84] ss:$16 sps:$4 sm:$0xff]   ;;  %v85_v32 = vrot.slane %v2900_v29, %v84_v25  ;;  %v73_v33 = vrot.slane %v2900_v29, %v72_v26  ;;  %v2420_v45 = vld [vmem:[#allocation2 + $0x4c] ss:$16 sps:$4 sm:$0xff]  }
  0x42   :  { %1018 = vmatpush1.bf16.msra.mxu0 %v2391_v12  ;;  %v2402_v30 = vld [vmem:[#allocation2 + $0x80] ss:$16 sps:$4 sm:$0xff]   ;;  %v2404_v34 = vld [vmem:[#allocation2 + $0xa4] ss:$16 sps:$4 sm:$0xff]   ;;  %v2418_v46 = vld [vmem:[#allocation2 + $0x48] ss:$16 sps:$4 sm:$0xff]  }
  0x43   :  { %1100 = vmatpush1.bf16.msra.mxu1 %v2392_v13  ;;  %1019 = vmatprep.subr.bf16.mxu0 %v2393_v14  ;;  %v1005_v28 = vand.u32 %v2193_v23, %v2892_v21  ;;  %v1002_v31 = vand.u32 %v2192_v24, %v2892_v21  ;;  %v92_v36 = vpack.c.bf16 %v73_v33, %v73_v33  ;;  %v2409_v39 = vld [vmem:[#allocation2 + $0xa0] ss:$16 sps:$4 sm:$0xff]   ;;  %v2410_v40 = vld [vmem:[#allocation2 + $0xc4] ss:$16 sps:$4 sm:$0xff]   ;;  %v2426_v49 = vld [vmem:[#allocation2 + $0x6c] ss:$16 sps:$4 sm:$0xff]  }
  0x44   :  { %1101 = vmatprep.subr.bf16.mxu1 %v2395_v18  ;;  %v2909_v38 = vpack.c.bf16 %v85_v32, %v85_v32  ;;  %v2415_v43 = vld [vmem:[#allocation2 + $0xc0] ss:$16 sps:$4 sm:$0xff]   ;;  %v2416_v44 = vld [vmem:[#allocation2 + $0xe4] ss:$16 sps:$4 sm:$0xff]   ;;  %v2424_v50 = vld [vmem:[#allocation2 + $0x68] ss:$16 sps:$4 sm:$0xff]  }
  0x45   :  { %1045 = vmatprep.mubr.bf16.mxu0 %v92_v36  ;;  %v2421_v47 = vld [vmem:[#allocation2 + $0xe0] ss:$16 sps:$4 sm:$0xff]   ;;  %v2422_v48 = vld [vmem:[#allocation2 + $0x104] ss:$16 sps:$4 sm:$0xff]   ;;  %v2432_v53 = vld [vmem:[#allocation2 + $0x8c] ss:$16 sps:$4 sm:$0xff]  }
  0x46   :  { %1020 = vmatpush1.bf16.msra.mxu0 %v2397_v19  ;;  %v2427_v51 = vld [vmem:[#allocation2 + $0x100] ss:$16 sps:$4 sm:$0xff]   ;;  %v2428_v52 = vld [vmem:[#allocation2 + $0x124] ss:$16 sps:$4 sm:$0xff]   ;;  %v2430_v54 = vld [vmem:[#allocation2 + $0x88] ss:$16 sps:$4 sm:$0xff]  }
  0x47   :  { %1102 = vmatpush1.bf16.msra.mxu1 %v2398_v22  ;;  %1021 = vmatprep.subr.bf16.mxu0 %v2399_v27  ;;  %v2433_v55 = vld [vmem:[#allocation2 + $0x120] ss:$16 sps:$4 sm:$0xff]   ;;  %v2434_v56 = vld [vmem:[#allocation2 + $0x144] ss:$16 sps:$4 sm:$0xff]   ;;  %v2438_v57 = vld [vmem:[#allocation2 + $0xac] ss:$16 sps:$4 sm:$0xff]  }
  0x48   :  { %1103 = vmatprep.subr.bf16.mxu1 %v1005_v28  ;;  %v2436_v58 = vld [vmem:[#allocation2 + $0xa8] ss:$16 sps:$4 sm:$0xff]   ;;  %v2439_v59 = vld [vmem:[#allocation2 + $0x140] ss:$16 sps:$4 sm:$0xff]   ;;  %v2440_v60 = vld [vmem:[#allocation2 + $0x164] ss:$16 sps:$4 sm:$0xff]  }
  0x49   :  { %v2444_v61 = vld [vmem:[#allocation2 + $0xcc] ss:$16 sps:$4 sm:$0xff]   ;;  %v2442_v62 = vld [vmem:[#allocation2 + $0xc8] ss:$16 sps:$4 sm:$0xff]   ;;  %v2445_v63 = vld [vmem:[#allocation2 + $0x160] ss:$16 sps:$4 sm:$0xff]  }
  0x4a   :  { %1022 = vmatpush1.bf16.msra.mxu0 %v2402_v30  ;;  %v2446_v1 = vld [vmem:[#allocation2 + $0x184] ss:$16 sps:$4 sm:$0xff]   ;;  %v2450_v2 = vld [vmem:[#allocation2 + $0xec] ss:$16 sps:$4 sm:$0xff]   ;;  %v2448_v3 = vld [vmem:[#allocation2 + $0xe8] ss:$16 sps:$4 sm:$0xff]  }
  0x4b   :  { %1104 = vmatpush1.bf16.msra.mxu1 %v1002_v31  ;;  %1023 = vmatprep.subr.bf16.mxu0 %v2404_v34  ;;  %v2451_v4 = vld [vmem:[#allocation2 + $0x180] ss:$16 sps:$4 sm:$0xff]   ;;  %v2452_v5 = vld [vmem:[#allocation2 + $0x1a4] ss:$16 sps:$4 sm:$0xff]   ;;  %v2456_v6 = vld [vmem:[#allocation2 + $0x10c] ss:$16 sps:$4 sm:$0xff]  }
  0x4c   :  { %1136 = vmatprep.subr.bf16.mxu1 %v2408_v35  ;;  %v2454_v7 = vld [vmem:[#allocation2 + $0x108] ss:$16 sps:$4 sm:$0xff]   ;;  %v2457_v8 = vld [vmem:[#allocation2 + $0x1a0] ss:$16 sps:$4 sm:$0xff]   ;;  %v2458_v9 = vld [vmem:[#allocation2 + $0x1c4] ss:$16 sps:$4 sm:$0xff]  }
  0x4d   :  { %v2462_v10 = vld [vmem:[#allocation2 + $0x12c] ss:$16 sps:$4 sm:$0xff]   ;;  %v68_v11 = vsub.s32 0, %v2890_v17  ;;  %v2460_v12 = vld [vmem:[#allocation2 + $0x128] ss:$16 sps:$4 sm:$0xff]   ;;  %v80_v16 = vsub.s32 3, %v2890_v17 }
  0x4e   :  { %2196 = vmatmul.mubr.msk.bf16.vlgmr.msra.gmra.mrb[0].mxu1 %vm993_vm2, %v2909_v38  ;;  %1024 = vmatpush1.bf16.msra.mxu0 %v2409_v39  ;;  %v2463_v13 = vld [vmem:[#allocation2 + $0x1c0] ss:$16 sps:$4 sm:$0xff]   ;;  %v2464_v14 = vld [vmem:[#allocation2 + $0x1e4] ss:$16 sps:$4 sm:$0xff]   ;;  %v2468_v15 = vld [vmem:[#allocation2 + $0x14c] ss:$16 sps:$4 sm:$0xff]  }
  0x4f   :  { %1137 = vmatpush1.bf16.msra.mxu1 %v2406_v37  ;;  %1025 = vmatprep.subr.bf16.mxu0 %v2410_v40  ;;  %v69_v18 = vrot.slane %v2900_v29, %v68_v11  ;;  %v2466_v19 = vld [vmem:[#allocation2 + $0x148] ss:$16 sps:$4 sm:$0xff]   ;;  %v2469_v20 = vld [vmem:[#allocation2 + $0x1e0] ss:$16 sps:$4 sm:$0xff]   ;;  %v2472_v22 = vld [vmem:[#allocation2 + $0x204] ss:$16 sps:$4 sm:$0xff]   ;;  %v81_v24 = vrot.slane %v2900_v29, %v80_v16 }
  0x50   :  { %1138 = vmatprep.subr.bf16.mxu1 %v2414_v41  ;;  %1168 = vmatprep.mubr.bf16.mxu1 %v92_v36  ;;  %v2475_v23 = vld [vmem:[#allocation2 + $0x16c] ss:$16 sps:$4 sm:$0xff]   ;;  %v2470_v28 = vld [vmem:[#allocation2 + $0x200] ss:$16 sps:$4 sm:$0xff]   ;;  %v2473_v30 = vld [vmem:[#allocation2 + $0x168] ss:$16 sps:$4 sm:$0xff]  }
  0x51   :  { %v91_v27 = vpack.c.bf16 %v69_v18, %v69_v18  ;;  %v2478_v31 = vld [vmem:[#allocation2 + $0x224] ss:$16 sps:$4 sm:$0xff]   ;;  %v2481_v32 = vld [vmem:[#allocation2 + $0x18c] ss:$16 sps:$4 sm:$0xff]   ;;  %v94_v33 = vpack.c.bf16 %v81_v24, %v81_v24  ;;  %v2476_v34 = vld [vmem:[#allocation2 + $0x220] ss:$16 sps:$4 sm:$0xff]  }
  0x52   :  { %1026 = vmatpush1.bf16.msra.mxu0 %v2415_v43  ;;  %v2479_v35 = vld [vmem:[#allocation2 + $0x188] ss:$16 sps:$4 sm:$0xff]   ;;  %v2484_v36 = vld [vmem:[#allocation2 + $0x244] ss:$16 sps:$4 sm:$0xff]   ;;  %v2487_v37 = vld [vmem:[#allocation2 + $0x1ac] ss:$16 sps:$4 sm:$0xff]  }
  0x53   :  { %1139 = vmatpush1.bf16.msra.mxu1 %v2412_v42  ;;  %1027 = vmatprep.subr.bf16.mxu0 %v2416_v44  ;;  %v2482_v39 = vld [vmem:[#allocation2 + $0x240] ss:$16 sps:$4 sm:$0xff]   ;;  %v2485_v40 = vld [vmem:[#allocation2 + $0x1a8] ss:$16 sps:$4 sm:$0xff]   ;;  %v2490_v41 = vld [vmem:[#allocation2 + $0x264] ss:$16 sps:$4 sm:$0xff]  }
  0x54   :  { %1140 = vmatprep.subr.bf16.mxu1 %v2420_v45  ;;  %v2493_v42 = vld [vmem:[#allocation2 + $0x1cc] ss:$16 sps:$4 sm:$0xff]   ;;  %v2488_v43 = vld [vmem:[#allocation2 + $0x260] ss:$16 sps:$4 sm:$0xff]   ;;  %v2491_v44 = vld [vmem:[#allocation2 + $0x1c8] ss:$16 sps:$4 sm:$0xff]  }
  0x55   :  { %v2496_v45 = vld [vmem:[#allocation2 + $0x284] ss:$16 sps:$4 sm:$0xff]   ;;  %v2547_v18 = vld [vmem:[#allocation2 + $0x2ec] ss:$16 sps:$4 sm:$0xff]   ;;  %v2548_v24 = vld [vmem:[#allocation2 + $0x3a0] ss:$16 sps:$4 sm:$0xff]  }
  0x56   :  { %1028 = vmatpush1.bf16.msra.mxu0 %v2421_v47  ;;  %v2494_v47 = vld [vmem:[#allocation2 + $0x280] ss:$16 sps:$4 sm:$0xff]   ;;  %vm2821_vm3 = vmmov 0  }
  0x57   :  { %1141 = vmatpush1.bf16.msra.mxu1 %v2418_v46  ;;  %1029 = vmatprep.subr.bf16.mxu0 %v2422_v48  ;;  %v2499_v46 = vld [vmem:[#allocation2 + $0x1ec] ss:$16 sps:$4 sm:$0xff]   ;;  %v2497_v48 = vld [vmem:[#allocation2 + $0x1e8] ss:$16 sps:$4 sm:$0xff]  }
  0x58   :  { %1142 = vmatprep.subr.bf16.mxu1 %v2426_v49  ;;  %v2502_v49 = vld [vmem:[#allocation2 + $0x2a4] ss:$16 sps:$4 sm:$0xff]  }
  0x5a   :  { %1030 = vmatpush1.bf16.msra.mxu0 %v2427_v51  ;;  %v2500_v51 = vld [vmem:[#allocation2 + $0x2a0] ss:$16 sps:$4 sm:$0xff]  }
  0x5b   :  { %1143 = vmatpush1.bf16.msra.mxu1 %v2424_v50  ;;  %1031 = vmatprep.subr.bf16.mxu0 %v2428_v52  ;;  %v2505_v50 = vld [vmem:[#allocation2 + $0x20c] ss:$16 sps:$4 sm:$0xff]   ;;  %v2503_v52 = vld [vmem:[#allocation2 + $0x208] ss:$16 sps:$4 sm:$0xff]  }
  0x5c   :  { %1144 = vmatprep.subr.bf16.mxu1 %v2432_v53  ;;  %v2508_v53 = vld [vmem:[#allocation2 + $0x2c4] ss:$16 sps:$4 sm:$0xff]  }
  0x5e   :  { %1032 = vmatpush1.bf16.msra.mxu0 %v2433_v55  ;;  %v2506_v55 = vld [vmem:[#allocation2 + $0x2c0] ss:$16 sps:$4 sm:$0xff]  }
  0x5f   :  { %1145 = vmatpush1.bf16.msra.mxu1 %v2430_v54  ;;  %1033 = vmatprep.subr.bf16.mxu0 %v2434_v56  ;;  %v2511_v54 = vld [vmem:[#allocation2 + $0x22c] ss:$16 sps:$4 sm:$0xff]   ;;  %v2509_v56 = vld [vmem:[#allocation2 + $0x228] ss:$16 sps:$4 sm:$0xff]  }
  0x60   :  { %1146 = vmatprep.subr.bf16.mxu1 %v2438_v57  ;;  %v2514_v57 = vld [vmem:[#allocation2 + $0x2e4] ss:$16 sps:$4 sm:$0xff]  }
  0x62   :  { %1034 = vmatpush1.bf16.msra.mxu0 %v2439_v59  ;;  %v2512_v59 = vld [vmem:[#allocation2 + $0x2e0] ss:$16 sps:$4 sm:$0xff]  }
  0x63   :  { %1147 = vmatpush1.bf16.msra.mxu1 %v2436_v58  ;;  %1035 = vmatprep.subr.bf16.mxu0 %v2440_v60  ;;  %v2517_v58 = vld [vmem:[#allocation2 + $0x24c] ss:$16 sps:$4 sm:$0xff]   ;;  %v2515_v60 = vld [vmem:[#allocation2 + $0x248] ss:$16 sps:$4 sm:$0xff]  }
  0x64   :  { %1148 = vmatprep.subr.bf16.mxu1 %v2444_v61  ;;  %v2520_v61 = vld [vmem:[#allocation2 + $0x304] ss:$16 sps:$4 sm:$0xff]  }
  0x66   :  { %1036 = vmatpush1.bf16.msra.mxu0 %v2445_v63  ;;  %v2518_v63 = vld [vmem:[#allocation2 + $0x300] ss:$16 sps:$4 sm:$0xff]  }
  0x67   :  { %1149 = vmatpush1.bf16.msra.mxu1 %v2442_v62  ;;  %1037 = vmatprep.subr.bf16.mxu0 %v2446_v1  ;;  %v2523_v62 = vld [vmem:[#allocation2 + $0x26c] ss:$16 sps:$4 sm:$0xff]   ;;  %v2521_v1 = vld [vmem:[#allocation2 + $0x268] ss:$16 sps:$4 sm:$0xff]  }
  0x68   :  { %1150 = vmatprep.subr.bf16.mxu1 %v2450_v2  ;;  %v2526_v2 = vld [vmem:[#allocation2 + $0x324] ss:$16 sps:$4 sm:$0xff]  }
  0x6a   :  { %1038 = vmatpush1.bf16.msra.mxu0 %v2451_v4  ;;  %v2524_v4 = vld [vmem:[#allocation2 + $0x320] ss:$16 sps:$4 sm:$0xff]  }
  0x6b   :  { %1151 = vmatpush1.bf16.msra.mxu1 %v2448_v3  ;;  %1039 = vmatprep.subr.bf16.mxu0 %v2452_v5  ;;  %v2529_v3 = vld [vmem:[#allocation2 + $0x28c] ss:$16 sps:$4 sm:$0xff]   ;;  %v2527_v5 = vld [vmem:[#allocation2 + $0x288] ss:$16 sps:$4 sm:$0xff]  }
  0x6c   :  { %1152 = vmatprep.subr.bf16.mxu1 %v2456_v6  ;;  %v2532_v6 = vld [vmem:[#allocation2 + $0x344] ss:$16 sps:$4 sm:$0xff]  }
  0x6e   :  { %1040 = vmatpush1.bf16.msra.mxu0 %v2457_v8  ;;  %v2530_v8 = vld [vmem:[#allocation2 + $0x340] ss:$16 sps:$4 sm:$0xff]  }
  0x6f   :  { %1153 = vmatpush1.bf16.msra.mxu1 %v2454_v7  ;;  %1041 = vmatprep.subr.bf16.mxu0 %v2458_v9  ;;  %v2535_v7 = vld [vmem:[#allocation2 + $0x2ac] ss:$16 sps:$4 sm:$0xff]   ;;  %v2533_v9 = vld [vmem:[#allocation2 + $0x2a8] ss:$16 sps:$4 sm:$0xff]  }
  0x70   :  { %1154 = vmatprep.subr.bf16.mxu1 %v2462_v10  ;;  %v2538_v10 = vld [vmem:[#allocation2 + $0x364] ss:$16 sps:$4 sm:$0xff]  }
  0x72   :  { %1042 = vmatpush1.bf16.msra.mxu0 %v2463_v13  ;;  %v2536_v13 = vld [vmem:[#allocation2 + $0x360] ss:$16 sps:$4 sm:$0xff]  }
  0x73   :  { %1155 = vmatpush1.bf16.msra.mxu1 %v2460_v12  ;;  %1043 = vmatprep.subr.bf16.mxu0 %v2464_v14  ;;  %v2541_v12 = vld [vmem:[#allocation2 + $0x2cc] ss:$16 sps:$4 sm:$0xff]   ;;  %v2539_v14 = vld [vmem:[#allocation2 + $0x2c8] ss:$16 sps:$4 sm:$0xff]  }
  0x74   :  { %1156 = vmatprep.subr.bf16.mxu1 %v2468_v15  ;;  %v2544_v15 = vld [vmem:[#allocation2 + $0x384] ss:$16 sps:$4 sm:$0xff]  }
  0x76   :  { %1044 = vmatpush1.bf16.msra.mxu0 %v2469_v20  ;;  %v2545_v20 = vld [vmem:[#allocation2 + $0x2e8] ss:$16 sps:$4 sm:$0xff]  }
  0x77   :  { %1157 = vmatpush1.bf16.msra.mxu1 %v2466_v19  ;;  %1054 = vmatprep.subr.bf16.mxu0 %v2472_v22  ;;  %v2542_v19 = vld [vmem:[#allocation2 + $0x380] ss:$16 sps:$4 sm:$0xff]   ;;  %v2550_v22 = vld [vmem:[#allocation2 + $0x3a4] ss:$16 sps:$4 sm:$0xff]  }
  0x78   :  { %1158 = vmatprep.subr.bf16.mxu1 %v2475_v23  ;;  %v2553_v23 = vld [vmem:[#allocation2 + $0x30c] ss:$16 sps:$4 sm:$0xff]  }
  0x79   :  { %1046 = vmatmul.mubr.bf16.vlgmr.msra.gmra.mrb[0].mxu0 %v91_v27 }
  0x7a   :  { %1055 = vmatpush1.bf16.msra.mxu0 %v2470_v28  ;;  %1086 = vmatprep.mubr.bf16.mxu0 %v94_v33  ;;  %v2556_v28 = vld [vmem:[#allocation2 + $0x3c4] ss:$16 sps:$4 sm:$0xff]  }
  0x7b   :  { %1159 = vmatpush1.bf16.msra.mxu1 %v2473_v30  ;;  %1056 = vmatprep.subr.bf16.mxu0 %v2478_v31  ;;  %v2559_v30 = vld [vmem:[#allocation2 + $0x32c] ss:$16 sps:$4 sm:$0xff]   ;;  %v2554_v31 = vld [vmem:[#allocation2 + $0x3c0] ss:$16 sps:$4 sm:$0xff]  }
  0x7c   :  { %1160 = vmatprep.subr.bf16.mxu1 %v2481_v32  ;;  %v2557_v32 = vld [vmem:[#allocation2 + $0x328] ss:$16 sps:$4 sm:$0xff]  }
  0x7e   :  { %1057 = vmatpush1.bf16.msra.mxu0 %v2476_v34  ;;  %v2565_v34 = vld [vmem:[#allocation2 + $0x34c] ss:$16 sps:$4 sm:$0xff]  }
  0x7f   :  { %1161 = vmatpush1.bf16.msra.mxu1 %v2479_v35  ;;  %1058 = vmatprep.subr.bf16.mxu0 %v2484_v36  ;;  %v76_v35 = vsub.s32 2, %v2890_v17  ;;  %v2560_v36 = vld [vmem:[#allocation2 + $0x3e0] ss:$16 sps:$4 sm:$0xff]  }
  0x80   :  { %1162 = vmatprep.subr.bf16.mxu1 %v2487_v37  ;;  %v2563_v37 = vld [vmem:[#allocation2 + $0x348] ss:$16 sps:$4 sm:$0xff]  }
  0x82   :  { %1059 = vmatpush1.bf16.msra.mxu0 %v2482_v39  ;;  %v77_v39 = vrot.slane %v2900_v29, %v76_v35  ;;  %v2603_v29 = vld [vmem:[#allocation5 + $0x24] ss:$8 sps:$4 sm:$0xff]  }
  0x83   :  { %1163 = vmatpush1.bf16.msra.mxu1 %v2485_v40  ;;  %1060 = vmatprep.subr.bf16.mxu0 %v2490_v41  ;;  %v2568_v40 = vld [vmem:[#allocation2 + $0x36c] ss:$16 sps:$4 sm:$0xff]  }
  0x84   :  { %1164 = vmatprep.subr.bf16.mxu1 %v2493_v42  ;;  %v2597_v41 = vld [vmem:[#allocation5 + $0x4] ss:$8 sps:$4 sm:$0xff]   ;;  %v2566_v42 = vld [vmem:[#allocation2 + $0x368] ss:$16 sps:$4 sm:$0xff]  }
  0x86   :  { %1061 = vmatpush1.bf16.msra.mxu0 %v2488_v43  ;;  %v2595_v43 = vld [vmem:[#allocation5] ss:$8 sps:$4 sm:$0xff]  }
  0x87   :  { %1165 = vmatpush1.bf16.msra.mxu1 %v2491_v44  ;;  %1062 = vmatprep.subr.bf16.mxu0 %v2496_v45  ;;  %v93_v44 = vpack.c.bf16 %v77_v39, %v77_v39  ;;  %v2571_v45 = vld [vmem:[#allocation2 + $0x38c] ss:$16 sps:$4 sm:$0xff]  }
  0x88   :  { %1166 = vmatprep.subr.bf16.mxu1 %v2499_v46  ;;  %v2600_v46 = vld [vmem:[#allocation5 + $0x14] ss:$8 sps:$4 sm:$0xff]  }
  0x8a   :  { %1063 = vmatpush1.bf16.msra.mxu0 %v2494_v47  ;;  %v2569_v47 = vld [vmem:[#allocation2 + $0x388] ss:$16 sps:$4 sm:$0xff]  }
  0x8b   :  { %1167 = vmatpush1.bf16.msra.mxu1 %v2497_v48  ;;  %1064 = vmatprep.subr.bf16.mxu0 %v2502_v49  ;;  %v2598_v48 = vld [vmem:[#allocation5 + $0x10] ss:$8 sps:$4 sm:$0xff]   ;;  %v2574_v49 = vld [vmem:[#allocation2 + $0x3ac] ss:$16 sps:$4 sm:$0xff]  }
  0x8c   :  { %1177 = vmatprep.subr.bf16.mxu1 %v2505_v50  ;;  %v2572_v50 = vld [vmem:[#allocation2 + $0x3a8] ss:$16 sps:$4 sm:$0xff]  }
  0x8e   :  { %1169 = vmatmul.mubr.bf16.vlgmr.msra.gmra.mrb[4].mxu1 %v91_v27  ;;  %1065 = vmatpush1.bf16.msra.mxu0 %v2500_v51  ;;  %v2551_v27 = vld [vmem:[#allocation2 + $0x308] ss:$16 sps:$4 sm:$0xff]  }
  0x8f   :  { %1178 = vmatpush1.bf16.msra.mxu1 %v2503_v52  ;;  %1066 = vmatprep.subr.bf16.mxu0 %v2508_v53  ;;  %v2601_v51 = vld [vmem:[#allocation5 + $0x20] ss:$8 sps:$4 sm:$0xff]   ;;  %v2577_v52 = vld [vmem:[#allocation2 + $0x3cc] ss:$16 sps:$4 sm:$0xff]  }
  0x90   :  { %1179 = vmatprep.subr.bf16.mxu1 %v2511_v54  ;;  %1209 = vmatprep.mubr.bf16.mxu1 %v94_v33  ;;  %v2562_v33 = vld [vmem:[#allocation2 + $0x3e4] ss:$16 sps:$4 sm:$0xff]   ;;  %v2575_v54 = vld [vmem:[#allocation2 + $0x3c8] ss:$16 sps:$4 sm:$0xff]  }
  0x91   :  { %v2606_v53 = vld [vmem:[#allocation5 + $0x34] ss:$8 sps:$4 sm:$0xff]  }
  0x92   :  { %1067 = vmatpush1.bf16.msra.mxu0 %v2506_v55  ;;  %v2604_v55 = vld [vmem:[#allocation5 + $0x30] ss:$8 sps:$4 sm:$0xff]  }
  0x93   :  { %1180 = vmatpush1.bf16.msra.mxu1 %v2509_v56  ;;  %1068 = vmatprep.subr.bf16.mxu0 %v2514_v57  ;;  %v2580_v56 = vld [vmem:[#allocation2 + $0x3ec] ss:$16 sps:$4 sm:$0xff]  }
  0x94   :  { %1181 = vmatprep.subr.bf16.mxu1 %v2517_v58  ;;  %v2609_v57 = vld [vmem:[#allocation5 + $0x44] ss:$8 sps:$4 sm:$0xff]   ;;  %v2578_v58 = vld [vmem:[#allocation2 + $0x3e8] ss:$16 sps:$4 sm:$0xff]  }
  0x96   :  { %1069 = vmatpush1.bf16.msra.mxu0 %v2512_v59  ;;  %v2607_v59 = vld [vmem:[#allocation5 + $0x40] ss:$8 sps:$4 sm:$0xff]  }
  0x97   :  { %1182 = vmatpush1.bf16.msra.mxu1 %v2515_v60  ;;  %1070 = vmatprep.subr.bf16.mxu0 %v2520_v61  ;;  %v2583_v60 = vld [vmem:[#allocation2 + $0x40c] ss:$16 sps:$4 sm:$0xff]  }
  0x98   :  { %1183 = vmatprep.subr.bf16.mxu1 %v2523_v62  ;;  %v2612_v61 = vld [vmem:[#allocation5 + $0x54] ss:$8 sps:$4 sm:$0xff]   ;;  %v2581_v62 = vld [vmem:[#allocation2 + $0x408] ss:$16 sps:$4 sm:$0xff]  }
  0x9a   :  { %1071 = vmatpush1.bf16.msra.mxu0 %v2518_v63  ;;  %v2586_v63 = vld [vmem:[#allocation2 + $0x42c] ss:$16 sps:$4 sm:$0xff]  }
  0x9b   :  { %1184 = vmatpush1.bf16.msra.mxu1 %v2521_v1  ;;  %1072 = vmatprep.subr.bf16.mxu0 %v2526_v2  ;;  %v2610_v1 = vld [vmem:[#allocation5 + $0x50] ss:$8 sps:$4 sm:$0xff]   ;;  %v2615_v2 = vld [vmem:[#allocation5 + $0x64] ss:$8 sps:$4 sm:$0xff]  }
  0x9c   :  { %1185 = vmatprep.subr.bf16.mxu1 %v2529_v3  ;;  %v2584_v3 = vld [vmem:[#allocation2 + $0x428] ss:$16 sps:$4 sm:$0xff]  }
  0x9e   :  { %1073 = vmatpush1.bf16.msra.mxu0 %v2524_v4  ;;  %v2589_v4 = vld [vmem:[#allocation2 + $0x44c] ss:$16 sps:$4 sm:$0xff]  }
  0x9f   :  { %1186 = vmatpush1.bf16.msra.mxu1 %v2527_v5  ;;  %1074 = vmatprep.subr.bf16.mxu0 %v2532_v6  ;;  %v2613_v5 = vld [vmem:[#allocation5 + $0x60] ss:$8 sps:$4 sm:$0xff]   ;;  %v241_v6 = vld [vmem:[#allocation2 + $0x488] sm:$0x33] }
  0xa0   :  { %1187 = vmatprep.subr.bf16.mxu1 %v2535_v7  ;;  %v2618_v7 = vld [vmem:[#allocation5 + $0x74] ss:$8 sps:$4 sm:$0xff]  }
  0xa2   :  { %1075 = vmatpush1.bf16.msra.mxu0 %v2530_v8  ;;  %v2587_v8 = vld [vmem:[#allocation2 + $0x448] ss:$16 sps:$4 sm:$0xff]  }
  0xa3   :  { %1188 = vmatpush1.bf16.msra.mxu1 %v2533_v9  ;;  %1076 = vmatprep.subr.bf16.mxu0 %v2538_v10  ;;  %v2592_v9 = vld [vmem:[#allocation2 + $0x46c] ss:$16 sps:$4 sm:$0xff]   ;;  %v2195_v10 = vcombine.high %v241_v6, %v241_v6 }
  0xa4   :  { %1189 = vmatprep.subr.bf16.mxu1 %v2541_v12  ;;  %v2616_v12 = vld [vmem:[#allocation5 + $0x70] ss:$8 sps:$4 sm:$0xff]  }
  0xa6   :  { %1077 = vmatpush1.bf16.msra.mxu0 %v2536_v13  ;;  %v2621_v13 = vld [vmem:[#allocation5 + $0x84] ss:$8 sps:$4 sm:$0xff]  }
  0xa7   :  { %1190 = vmatpush1.bf16.msra.mxu1 %v2539_v14  ;;  %1078 = vmatprep.subr.bf16.mxu0 %v2544_v15  ;;  %v2590_v14 = vld [vmem:[#allocation2 + $0x468] ss:$16 sps:$4 sm:$0xff]   ;;  %v2194_v15 = vcombine.low %v241_v6, %v241_v6 }
  0xa8   :  { %1191 = vmatprep.subr.bf16.mxu1 %v2547_v18  ;;  %v2619_v18 = vld [vmem:[#allocation5 + $0x80] ss:$8 sps:$4 sm:$0xff]  }
  0xaa   :  { %1079 = vmatpush1.bf16.msra.mxu0 %v2542_v19  ;;  %v2624_v19 = vld [vmem:[#allocation5 + $0x94] ss:$8 sps:$4 sm:$0xff]  }
  0xab   :  { %1192 = vmatpush1.bf16.msra.mxu1 %v2545_v20  ;;  %1080 = vmatprep.subr.bf16.mxu0 %v2550_v22  ;;  %v1008_v20 = vand.u32 %v2194_v15, %v2892_v21  ;;  %v2622_v22 = vld [vmem:[#allocation5 + $0x90] ss:$8 sps:$4 sm:$0xff]  }
  0xac   :  { %1193 = vmatprep.subr.bf16.mxu1 %v2553_v23  ;;  %v2627_v23 = vld [vmem:[#allocation5 + $0xa4] ss:$8 sps:$4 sm:$0xff]   ;;  %v2658_v15 = vld [vmem:[#allocation5 + $0x150] ss:$8 sps:$4 sm:$0xff]  }
  0xae   :  { %1081 = vmatpush1.bf16.msra.mxu0 %v2548_v24  ;;  %v2625_v24 = vld [vmem:[#allocation5 + $0xa0] ss:$8 sps:$4 sm:$0xff]  }
  0xaf   :  { %1194 = vmatpush1.bf16.msra.mxu1 %v2551_v27  ;;  %1082 = vmatprep.subr.bf16.mxu0 %v2556_v28  ;;  %v2630_v27 = vld [vmem:[#allocation5 + $0xb4] ss:$8 sps:$4 sm:$0xff]   ;;  %v2628_v28 = vld [vmem:[#allocation5 + $0xb0] ss:$8 sps:$4 sm:$0xff]  }
  0xb0   :  { %1195 = vmatprep.subr.bf16.mxu1 %v2559_v30  ;;  %v2633_v30 = vld [vmem:[#allocation5 + $0xc4] ss:$8 sps:$4 sm:$0xff]  }
  0xb2   :  { %1083 = vmatpush1.bf16.msra.mxu0 %v2554_v31  ;;  %v2631_v31 = vld [vmem:[#allocation5 + $0xc0] ss:$8 sps:$4 sm:$0xff]  }
  0xb3   :  { %1196 = vmatpush1.bf16.msra.mxu1 %v2557_v32  ;;  %1084 = vmatprep.subr.bf16.mxu0 %v2562_v33  ;;  %v2634_v32 = vld [vmem:[#allocation5 + $0xd0] ss:$8 sps:$4 sm:$0xff]   ;;  %v2639_v33 = vld [vmem:[#allocation5 + $0xe4] ss:$8 sps:$4 sm:$0xff]  }
  0xb4   :  { %1197 = vmatprep.subr.bf16.mxu1 %v2565_v34  ;;  %v2637_v34 = vld [vmem:[#allocation5 + $0xe0] ss:$8 sps:$4 sm:$0xff]  }
  0xb6   :  { %1085 = vmatpush1.bf16.msra.mxu0 %v2560_v36  ;;  %v2642_v36 = vld [vmem:[#allocation5 + $0xf4] ss:$8 sps:$4 sm:$0xff]  }
  0xb7   :  { %1198 = vmatpush1.bf16.msra.mxu1 %v2563_v37  ;;  %1661 = vmatprep.subr.bf16.mxu0 %v2597_v41  ;;  %v2640_v37 = vld [vmem:[#allocation5 + $0xf0] ss:$8 sps:$4 sm:$0xff]  }
  0xb8   :  { %1199 = vmatprep.subr.bf16.mxu1 %v2568_v40 }
  0xb9   :  { %1087 = vmatmul.mubr.bf16.vlgmr.msra.gmra.mrb[0].mxu0 %v93_v44 }
  0xba   :  { %1662 = vmatpush1.bf16.msra.mxu0 %v2595_v43  ;;  %v2691_v43 = vld [vmem:[#allocation7 + $0x40] sm:$0xff]  }
  0xbb   :  { %1200 = vmatpush1.bf16.msra.mxu1 %v2566_v42  ;;  %1663 = vmatprep.subr.bf16.mxu0 %v2600_v46  ;;  %v2694_v46 = vld [vmem:[#allocation7 + $0x8] sm:$0xff]  }
  0xbc   :  { %1201 = vmatprep.subr.bf16.mxu1 %v2571_v45  ;;  %v2693_v45 = vld [vmem:[#allocation7 + $0x48] sm:$0xff]  }
  0xbe   :  { %1664 = vmatpush1.bf16.msra.mxu0 %v2598_v48  ;;  %v2696_v48 = vld [vmem:[#allocation7 + $0x10] sm:$0xff]  }
  0xbf   :  { %1202 = vmatpush1.bf16.msra.mxu1 %v2569_v47  ;;  %1665 = vmatprep.subr.bf16.mxu0 %v2603_v29  ;;  %v2695_v47 = vld [vmem:[#allocation7 + $0x50] sm:$0xff]   ;;  %v2698_v29 = vld [vmem:[#allocation7 + $0x18] sm:$0xff]  }
  0xc0   :  { %1203 = vmatprep.subr.bf16.mxu1 %v2574_v49  ;;  %v2697_v49 = vld [vmem:[#allocation7 + $0x58] sm:$0xff]  }
  0xc2   :  { %1666 = vmatpush1.bf16.msra.mxu0 %v2601_v51  ;;  %v2700_v51 = vld [vmem:[#allocation7 + $0x20] sm:$0xff]  }
  0xc3   :  { %1204 = vmatpush1.bf16.msra.mxu1 %v2572_v50  ;;  %1667 = vmatprep.subr.bf16.mxu0 %v2606_v53  ;;  %v2699_v50 = vld [vmem:[#allocation7 + $0x60] sm:$0xff]   ;;  %v2702_v53 = vld [vmem:[#allocation7 + $0x28] sm:$0xff]  }
  0xc4   :  { %1205 = vmatprep.subr.bf16.mxu1 %v2577_v52  ;;  %v2701_v52 = vld [vmem:[#allocation7 + $0x68] sm:$0xff]  }
  0xc6   :  { %1668 = vmatpush1.bf16.msra.mxu0 %v2604_v55 }
  0xc7   :  { %1206 = vmatpush1.bf16.msra.mxu1 %v2575_v54  ;;  %1669 = vmatprep.subr.bf16.mxu0 %v2609_v57  ;;  %v2933_v54 = vld [vmem:[%s2972_s4] sm:$0xff]  ;;  %s2822_s4 = smov [#allocation8]  }
  0xc8   :  { %1207 = vmatprep.subr.bf16.mxu1 %v2580_v56  ;;  %v976_v55 = vrot.slane %v2933_v54, %v68_v11  ;;  %v980_v56 = vrot.slane %v2933_v54, %v72_v26  ;;  %v2646_v11 = vld [vmem:[#allocation5 + $0x110] ss:$8 sps:$4 sm:$0xff]   ;;  %v2651_v26 = vld [vmem:[#allocation5 + $0x124] ss:$8 sps:$4 sm:$0xff]   ;;  %s2038_s10 = sshll.u32 %s2822_s4, 4  ;;  %s2039_s10 = int_to_ptr.vmem [resolvable:$true] %s2038_s10 }
  0xc9   :  { %s2781_s11 = scalar_lea.vmem %s2039_s10, 16  ;;  %s2785_s12 = scalar_lea.vmem %s2039_s10, 32 }
  0xca   :  { %1670 = vmatpush1.bf16.msra.mxu0 %v2607_v59  ;;  %p2782_p10 = scmp.ne.s32.totalorder %s2039_s10, %s2781_s11  ;;  %p2786_p11 = scmp.lt.s32.totalorder %s2039_s10, %s2039_s10 }
  0xcb   :  { %1208 = vmatpush1.bf16.msra.mxu1 %v2578_v58  ;;  %1671 = vmatprep.subr.bf16.mxu0 %v2612_v61  ;;  %p2787_p12 = scmp.lt.s32.totalorder %s2785_s12, %s2781_s11 }
  0xcc   :  { %1218 = vmatprep.subr.bf16.mxu1 %v2583_v60 }
  0xcd   :  { %p2788_p13 = por %p2787_p12, %p2786_p11 }
  0xce   :  { %1210 = vmatmul.mubr.bf16.vlgmr.msra.gmra.mrb[4].mxu1 %v93_v44  ;;  %1672 = vmatpush1.bf16.msra.mxu0 %v2610_v1  ;;  %v2692_v44 = vld [vmem:[#allocation7] sm:$0xff]  }
  0xcf   :  { %1219 = vmatpush1.bf16.msra.mxu1 %v2581_v62  ;;  %1250 = vmatprep.mubr.bf16.mxu1 %v2818_v0  ;;  %v1011_v0 = vand.u32 %v2195_v10, %v2892_v21  ;;  %v2636_v21 = vld [vmem:[#allocation5 + $0xd4] ss:$8 sps:$4 sm:$0xff]   ;;  %v2652_v10 = vld [vmem:[#allocation5 + $0x130] ss:$8 sps:$4 sm:$0xff]   ;;  %p2789_p0 = pnand %p2788_p13, %p2782_p10 }
  0xd0   :  { %1220 = vmatprep.subr.bf16.mxu1 %v2586_v63  ;;  %1673 = vmatprep.subr.bf16.mxu0 %v2615_v2 }
  0xd2   :  { %1674 = vmatpush1.bf16.msra.mxu0 %v2613_v5  ;;  %v2643_v5 = vld [vmem:[#allocation5 + $0x100] ss:$8 sps:$4 sm:$0xff]  }
  0xd3   :  { %1221 = vmatpush1.bf16.msra.mxu1 %v2584_v3  ;;  %1675 = vmatprep.subr.bf16.mxu0 %v2618_v7  ;;  %v2648_v7 = vld [vmem:[#allocation5 + $0x114] ss:$8 sps:$4 sm:$0xff]  }
  0xd4   :  { %1222 = vmatprep.subr.bf16.mxu1 %v2589_v4 }
  0xd6   :  { %1676 = vmatpush1.bf16.msra.mxu0 %v2616_v12  ;;  %v2657_v12 = vld [vmem:[#allocation5 + $0x144] ss:$8 sps:$4 sm:$0xff]  }
  0xd7   :  { %1223 = vmatpush1.bf16.msra.mxu1 %v2587_v8  ;;  %1677 = vmatprep.subr.bf16.mxu0 %v2621_v13  ;;  %v2649_v8 = vld [vmem:[#allocation5 + $0x120] ss:$8 sps:$4 sm:$0xff]  }
  0xd8   :  { %1224 = vmatprep.subr.bf16.mxu1 %v2592_v9  ;;  %v2654_v9 = vld [vmem:[#allocation5 + $0x134] ss:$8 sps:$4 sm:$0xff]   ;;  %v2655_v13 = vld [vmem:[#allocation5 + $0x140] ss:$8 sps:$4 sm:$0xff]  }
  0xda   :  { %1678 = vmatpush1.bf16.msra.mxu0 %v2619_v18  ;;  %v2661_v18 = vld [vmem:[#allocation5 + $0x160] ss:$8 sps:$4 sm:$0xff]  }
  0xdb   :  { %1225 = vmatpush1.bf16.msra.mxu1 %v2590_v14  ;;  %1679 = vmatprep.subr.bf16.mxu0 %v2624_v19  ;;  %v2660_v14 = vld [vmem:[#allocation5 + $0x154] ss:$8 sps:$4 sm:$0xff]  }
  0xdc   :  { %1226 = vmatprep.subr.bf16.mxu1 %v1011_v0  ;;  %v2663_v0 = vld [vmem:[#allocation5 + $0x164] ss:$8 sps:$4 sm:$0xff]   ;;  %v2666_v19 = vld [vmem:[#allocation5 + $0x174] ss:$8 sps:$4 sm:$0xff]  }
  0xde   :  { %1680 = vmatpush1.bf16.msra.mxu0 %v2622_v22  ;;  %v2669_v22 = vld [vmem:[#allocation5 + $0x184] ss:$8 sps:$4 sm:$0xff]  }
  0xdf   :  { %1227 = vmatpush1.bf16.msra.mxu1 %v1008_v20  ;;  %1681 = vmatprep.subr.bf16.mxu0 %v2627_v23  ;;  %v2664_v20 = vld [vmem:[#allocation5 + $0x170] ss:$8 sps:$4 sm:$0xff]   ;;  %v988_v23 = vrot.slane %v2933_v54, %v80_v16  ;;  %v2678_v16 = vld [vmem:[#allocation5 + $0x1b4] ss:$8 sps:$4 sm:$0xff]  }
  0xe0   :  { %2286 = vmatprep.subr.bf16.mxu1 %v2691_v43  ;;  %v2682_v43 = vld [vmem:[#allocation5 + $0x1d0] ss:$8 sps:$4 sm:$0xff]  }
  0xe2   :  { %2197 = vmatmul.mubr.msk.bf16.vlgmr.msra.gmra.mrb[4].mxu1 %vm993_vm2, %v2909_v38  ;;  %1682 = vmatpush1.bf16.msra.mxu0 %v2625_v24  ;;  %v2645_v38 = vld [vmem:[#allocation5 + $0x104] ss:$8 sps:$4 sm:$0xff]  }
  0xe3   :  { %1683 = vmatprep.subr.bf16.mxu0 %v2630_v27  ;;  %2287 = vmatpush3.bf16.msra.mxu1 %v2692_v44  ;;  %v2667_v27 = vld [vmem:[#allocation5 + $0x180] ss:$8 sps:$4 sm:$0xff]   ;;  %v984_v44 = vrot.slane %v2933_v54, %v76_v35  ;;  %v2706_v35 = vld [vmem:[#allocation7 + $0x38] sm:$0xff]  }
  0xe4   :  { %2288 = vmatprep.subr.bf16.mxu1 %v2693_v45  ;;  %v2687_v45 = vld [vmem:[#allocation5 + $0x1e4] ss:$8 sps:$4 sm:$0xff]  }
  0xe6   :  { %1684 = vmatpush1.bf16.msra.mxu0 %v2628_v28 }
  0xe7   :  { %1685 = vmatprep.subr.bf16.mxu0 %v2633_v30  ;;  %2289 = vmatpush3.bf16.msra.mxu1 %v2694_v46  ;;  %v2672_v30 = vld [vmem:[#allocation5 + $0x194] ss:$8 sps:$4 sm:$0xff]   ;;  %v2685_v46 = vld [vmem:[#allocation5 + $0x1e0] ss:$8 sps:$4 sm:$0xff]  }
  0xe8   :  { %2290 = vmatprep.subr.bf16.mxu1 %v2695_v47 }
  0xea   :  { %1686 = vmatpush1.bf16.msra.mxu0 %v2631_v31 }
  0xeb   :  { %1687 = vmatprep.subr.bf16.mxu0 %v2636_v21  ;;  %2291 = vmatpush3.bf16.msra.mxu1 %v2696_v48  ;;  %v2690_v48 = vld [vmem:[#allocation5 + $0x1f4] ss:$8 sps:$4 sm:$0xff]  }
  0xec   :  { %2292 = vmatprep.subr.bf16.mxu1 %v2697_v49  ;;  %v2688_v49 = vld [vmem:[#allocation5 + $0x1f0] ss:$8 sps:$4 sm:$0xff]  }
  0xee   :  { %1688 = vmatpush1.bf16.msra.mxu0 %v2634_v32 }
  0xef   :  { %1689 = vmatprep.subr.bf16.mxu0 %v2639_v33  ;;  %2293 = vmatpush3.bf16.msra.mxu1 %v2698_v29 }
  0xf0   :  { %2294 = vmatprep.subr.bf16.mxu1 %v2699_v50 }
  0xf2   :  { %1690 = vmatpush1.bf16.msra.mxu0 %v2637_v34  ;;  %v2670_v34 = vld [vmem:[#allocation5 + $0x190] ss:$8 sps:$4 sm:$0xff]  }
  0xf3   :  { %1691 = vmatprep.subr.bf16.mxu0 %v2642_v36  ;;  %2295 = vmatpush3.bf16.msra.mxu1 %v2700_v51  ;;  %v2675_v36 = vld [vmem:[#allocation5 + $0x1a4] ss:$8 sps:$4 sm:$0xff]   ;;  %v2703_v51 = vld [vmem:[#allocation7 + $0x70] sm:$0xff]  }
  0xf4   :  { %2296 = vmatprep.subr.bf16.mxu1 %v2701_v52  ;;  %v2704_v52 = vld [vmem:[#allocation7 + $0x30] sm:$0xff]  }
  0xf6   :  { %1692 = vmatpush1.bf16.msra.mxu0 %v2640_v37 }
  0xf7   :  { %1702 = vmatprep.subr.bf16.mxu0 %v2645_v38  ;;  %2297 = vmatpush3.bf16.msra.mxu1 %v2702_v53  ;;  %v2673_v38 = vld [vmem:[#allocation5 + $0x1a0] ss:$8 sps:$4 sm:$0xff]   ;;  %v2705_v53 = vld [vmem:[#allocation7 + $0x78] sm:$0xff]  }
  0xf8   :  { %2298 = vmatprep.subr.bf16.mxu1 %v2703_v51 }
  0xfb   :  { %2299 = vmatpush3.bf16.msra.mxu1 %v2704_v52 }
  0xfc   :  { %2300 = vmatprep.subr.bf16.mxu1 %v2705_v53 }
  0xff   :  { %2301 = vmatpush3.bf16.msra.mxu1 %v2706_v35 }
 0x121   :  { %v1129_v39 = vpop.f32.mrb[0].mxu1 }
 0x122   :  { %v1131_v40 = vpop.f32.mrb[1].mxu1 }
 0x123   :  { %v1133_v41 = vpop.f32.mrb[2].mxu1 }
 0x124   :  { %v1134_v42 = vpop.f32.mrb[3].mxu1  ;;  %v2679_v41 = vld [vmem:[#allocation5 + $0x1c0] ss:$8 sps:$4 sm:$0xff]  }
 0x125   :  { %v2684_v42 = vld [vmem:[#allocation5 + $0x1d4] ss:$8 sps:$4 sm:$0xff]  }
 0x18c   :  { %v1088_v57 = vpop.f32.mrb[0].mxu0 }
 0x18d   :  { %v2337_v58 = vadd.f32 %v1088_v57, %v976_v55  ;;  %v1090_v59 = vpop.f32.mrb[1].mxu0  ;;  %v2820_v55 = vmov 0.0   ;;  %v1654_v57 = vrot.slane %v2933_v54, %v84_v25  ;;  %v2709_v25 = vld [vmem:[#allocation7 + $0x90] sm:$0xff]  }
 0x18e   :  { %v2339_v60 = vadd.f32 %v1090_v59, %v980_v56  ;;  %v1092_v61 = vpop.f32.mrb[2].mxu0  ;;  %2317 = vmatprep.subr.bf16.mxu1 %v2820_v55  ;;  %v1657_v56 = vsub.s32 5, %v2890_v17 }
 0x18f   :  { %v2338_v62 = vadd.f32 %v2337_v58, %v1129_v39  ;;  %v1093_v63 = vpop.f32.mrb[3].mxu0  ;;  %v2676_v39 = vld [vmem:[#allocation5 + $0x1b0] ss:$8 sps:$4 sm:$0xff]  }
 0x190   :  { %v2340_v1 = vadd.f32 %v2339_v60, %v1131_v40  ;;  %v2681_v40 = vld [vmem:[#allocation5 + $0x1c4] ss:$8 sps:$4 sm:$0xff]   ;;  %v1658_v58 = vrot.slane %v2933_v54, %v1657_v56 }
 0x191   :  { %v1259_v2 = vmax.f32 %v2338_v62, 0.0 }
 0x192   :  { %v1260_v3 = vmax.f32 %v2340_v1, 0.0 }
 0x193   :  { %v1263_v6 = vpack.c.bf16 %v1259_v2, %v1259_v2 }
 0x194   :  { %v1264_v4 = vpack.c.bf16 %v1260_v3, %v1260_v3 }
 0x196   :  { %1693 = vmatprep.mubr.bf16.mxu0 %v1264_v4 }
 0x197   :  { %1694 = vmatmul.mubr.bf16.vlgmr.msra.gmra.mrb[4].mxu0 %v1263_v6 }
 0x198   :  { %1703 = vmatpush1.bf16.msra.mxu0 %v2643_v5  ;;  %v2707_v5 = vld [vmem:[#allocation7 + $0x80] sm:$0xff]  }
 0x199   :  { %1704 = vmatprep.subr.bf16.mxu0 %v2648_v7  ;;  %v2708_v7 = vld [vmem:[#allocation7 + $0x88] sm:$0xff]  }
 0x19c   :  { %1705 = vmatpush1.bf16.msra.mxu0 %v2646_v11  ;;  %v2710_v11 = vld [vmem:[#allocation7 + $0x98] sm:$0xff]  }
 0x19d   :  { %1706 = vmatprep.subr.bf16.mxu0 %v2651_v26  ;;  %v2711_v26 = vld [vmem:[#allocation7 + $0xa0] sm:$0xff]  }
 0x1a0   :  { %1707 = vmatpush1.bf16.msra.mxu0 %v2649_v8  ;;  %v2712_v8 = vld [vmem:[#allocation7 + $0xa8] sm:$0xff]  }
 0x1a1   :  { %1708 = vmatprep.subr.bf16.mxu0 %v2654_v9  ;;  %v2713_v9 = vld [vmem:[#allocation7 + $0xb0] sm:$0xff]  }
 0x1a4   :  { %1709 = vmatpush1.bf16.msra.mxu0 %v2652_v10  ;;  %v2714_v10 = vld [vmem:[#allocation7 + $0xb8] sm:$0xff]  }
 0x1a5   :  { %1710 = vmatprep.subr.bf16.mxu0 %v2657_v12  ;;  %v1877_v12 = vsub.s32 6, %v2890_v17 }
 0x1a8   :  { %1711 = vmatpush1.bf16.msra.mxu0 %v2655_v13 }
 0x1a9   :  { %1712 = vmatprep.subr.bf16.mxu0 %v2660_v14  ;;  %v1878_v14 = vrot.slane %v2933_v54, %v1877_v12 }
 0x1ac   :  { %1713 = vmatpush1.bf16.msra.mxu0 %v2658_v15 }
 0x1ad   :  { %1714 = vmatprep.subr.bf16.mxu0 %v2663_v0 }
 0x1b0   :  { %1715 = vmatpush1.bf16.msra.mxu0 %v2661_v18 }
 0x1b1   :  { %1716 = vmatprep.subr.bf16.mxu0 %v2666_v19 }
 0x1b4   :  { %1717 = vmatpush1.bf16.msra.mxu0 %v2664_v20 }
 0x1b5   :  { %v1252_v24 = vpop.f32.mrb[4].mxu1  ;;  %1718 = vmatprep.subr.bf16.mxu0 %v2669_v22 }
 0x1b6   :  { %v1254_v28 = vpop.f32.mrb[5].mxu1  ;;  %v2341_v47 = vadd.f32 %v1252_v24, %v984_v44  ;;  %v1988_v24 = vsub.s32 7, %v2890_v17 }
 0x1b7   :  { %v2342_v31 = vadd.f32 %v1254_v28, %v988_v23  ;;  %v1256_v21 = vpop.f32.mrb[6].mxu1 }
 0x1b8   :  { %v1257_v32 = vpop.f32.mrb[7].mxu1  ;;  %1719 = vmatpush1.bf16.msra.mxu0 %v2667_v27  ;;  %v1261_v29 = vmax.f32 %v2341_v47, 0.0  ;;  %v1989_v27 = vrot.slane %v2933_v54, %v1988_v24 }
 0x1b9   :  { %v1262_v33 = vmax.f32 %v2342_v31, 0.0  ;;  %1720 = vmatprep.subr.bf16.mxu0 %v2672_v30 }
 0x1ba   :  { %v1265_v50 = vpack.c.bf16 %v1261_v29, %v1261_v29 }
 0x1bb   :  { %v1266_v37 = vpack.c.bf16 %v1262_v33, %v1262_v33 }
 0x1bc   :  { %1721 = vmatpush1.bf16.msra.mxu0 %v2670_v34 }
 0x1bd   :  { %1734 = vmatprep.mubr.bf16.mxu0 %v1266_v37  ;;  %1722 = vmatprep.subr.bf16.mxu0 %v2675_v36 }
 0x1c0   :  { %1723 = vmatpush1.bf16.msra.mxu0 %v2673_v38 }
 0x1c1   :  { %1724 = vmatprep.subr.bf16.mxu0 %v2678_v16 }
 0x1c4   :  { %1725 = vmatpush1.bf16.msra.mxu0 %v2676_v39 }
 0x1c5   :  { %1726 = vmatprep.subr.bf16.mxu0 %v2681_v40 }
 0x1c8   :  { %1727 = vmatpush1.bf16.msra.mxu0 %v2679_v41 }
 0x1c9   :  { %1728 = vmatprep.subr.bf16.mxu0 %v2684_v42 }
 0x1cc   :  { %1729 = vmatpush1.bf16.msra.mxu0 %v2682_v43 }
 0x1cd   :  { %1730 = vmatprep.subr.bf16.mxu0 %v2687_v45 }
 0x1d0   :  { %1731 = vmatpush1.bf16.msra.mxu0 %v2685_v46 }
 0x1d1   :  { %1732 = vmatprep.subr.bf16.mxu0 %v2690_v48 }
 0x1d4   :  { %1733 = vmatpush1.bf16.msra.mxu0 %v2688_v49 }
 0x1d7   :  { %1735 = vmatmul.mubr.bf16.vlgmr.msra.gmra.mrb[4].mxu0 %v1265_v50 }
 0x2aa   :  { %v1736_v59 = vpop.f32.mrb[4].mxu0 }
 0x2ab   :  { %v2343_v60 = vadd.f32 %v1736_v59, %v1654_v57  ;;  %v1738_v61 = vpop.f32.mrb[5].mxu0 }
 0x2ac   :  { %v2344_v62 = vadd.f32 %v1738_v61, %v1658_v58  ;;  %v1740_v63 = vpop.f32.mrb[6].mxu0 }
 0x2ad   :  { %v1743_v1 = vmax.f32 %v2343_v60, 0.0  ;;  %v1741_v2 = vpop.f32.mrb[7].mxu0 }
 0x2ae   :  { %v1744_v3 = vmax.f32 %v2344_v62, 0.0 }
 0x2af   :  { %v1745_v6 = vpack.c.bf16 %v1743_v1, %v1743_v1 }
 0x2b0   :  { %v1746_v4 = vpack.c.bf16 %v1744_v3, %v1744_v3 }
 0x2b2   :  { %1912 = vmatprep.mubr.bf16.mxu1 %v1746_v4 }
 0x2b3   :  { %1913 = vmatmul.mubr.bf16.vlgmr.msra.gmra.mrb[8].mxu1 %v1745_v6 }
 0x2b4   :  { %2318 = vmatpush3.bf16.msra.mxu1 %v2707_v5  ;;  %2333 = vmatprep.mubr.msk.bf16.mxu1 %vm2821_vm3, %v2820_v55 }
 0x2b5   :  { %2319 = vmatprep.subr.bf16.mxu1 %v2820_v55 }
 0x2b8   :  { %2320 = vmatpush3.bf16.msra.mxu1 %v2708_v7 }
 0x2b9   :  { %2321 = vmatprep.subr.bf16.mxu1 %v2820_v55 }
 0x2bc   :  { %2322 = vmatpush3.bf16.msra.mxu1 %v2709_v25 }
 0x2bd   :  { %2323 = vmatprep.subr.bf16.mxu1 %v2820_v55 }
 0x2c0   :  { %2324 = vmatpush3.bf16.msra.mxu1 %v2710_v11 }
 0x2c1   :  { %2325 = vmatprep.subr.bf16.mxu1 %v2820_v55 }
 0x2c4   :  { %2326 = vmatpush3.bf16.msra.mxu1 %v2711_v26 }
 0x2c5   :  { %2327 = vmatprep.subr.bf16.mxu1 %v2820_v55 }
 0x2c8   :  { %2328 = vmatpush3.bf16.msra.mxu1 %v2712_v8 }
 0x2c9   :  { %2329 = vmatprep.subr.bf16.mxu1 %v2820_v55 }
 0x2cc   :  { %2330 = vmatpush3.bf16.msra.mxu1 %v2713_v9 }
 0x2cd   :  { %2331 = vmatprep.subr.bf16.mxu1 %v2820_v55 }
 0x2d0   :  { %2332 = vmatpush3.bf16.msra.mxu1 %v2714_v10 }
 0x386   :  { %v2302_v13 = vpop.f32.mrb[8].mxu1 }
 0x387   :  { %v2303_v15 = vpop.f32.mrb[9].mxu1 }
 0x388   :  { %v2304_v0 = vadd.f32 %v2303_v15, %v2302_v13  ;;  %v2305_v18 = vpop.f32.mrb[10].mxu1 }
 0x389   :  { %v2306_v19 = vpop.f32.mrb[11].mxu1 }
 0x38a   :  { %v1915_v20 = vadd.f32 %v2304_v0, %v1878_v14 }
 0x38c   :  { %v1920_v22 = vmax.f32 %v1915_v20, 0.0 }
 0x38e   :  { %v1921_v23 = vpack.c.bf16 %v1920_v22, %v1920_v22 }
 0x390   :  { %2334 = vmatmul.mubr.bf16.vlgmr.msra.gmra.mrb[12].mxu1 %v1921_v23 }
 0x463   :  { %v2025_v28 = vpop.f32.mrb[12].mxu1 }
 0x464   :  { %v2026_v30 = vadd.f32 %v2025_v28, %v1989_v27  ;;  %v2335_v31 = vpop.f32.mrb[13].mxu1 }
 0x465   :  { %v2028_v21 = vpop.f32.mrb[14].mxu1 }
 0x466   :  { %2031 = vst [vmem:[#allocation8] sm:$0x1] %v2026_v30  ;;  %v2336_v32 = vpop.f32.mrb[15].mxu1 }
 0x467   :  { %2792 = shalt.err (!%p2789_p0)
}
 0x468   :  { %s2793_s15 = scalar_lea.hbm %s2973_s5, 16 }
 0x469   :  { %p2794_p1 = scmp.ne.s32.totalorder %s2973_s5, %s2793_s15  ;;  %p2797_p2 = scmp.lt.u32.totalorder %s2793_s15, %s2973_s5 }
 0x46b   :  { %p2799_p3 = pnand %p2797_p2, %p2794_p1 }
 0x46d   :  { %2802 = shalt.err (!%p2799_p3)
}
 0x46e   :  { %2041 = dma.vmem_to_hbm [thread:$0]  %s2039_s10, 16, %s2973_s5, [#allocation4]  }
 0x46f   :  { %2807 = dma.done.wait [#allocation4], 16  }
 0x470   :  { %2808 = vsyncadd [#allocation4], 4294967280 }
 0x471   :  { %2045 = vsyncpa [#allocation3], 1 }
 0x472   :  { %2046 = vsyncpa [#allocation6], 1 }
 0x473   :  { %2047 = vsyncpa [#allocation4], 1 }

</bundles_post_ra>
